<compile_context>
chip_gen: v5e
topology: v5e:2x2
jax: 0.10.0
libtpu: 0.0.40
codegen_flags: <defaults>
</compile_context>

<pallas_src>
import functools

import jax
import jax.numpy as jnp
from jax.experimental import pallas as pl
from jax.experimental.pallas import tpu as pltpu


_HALF = 64                  # lane offset of the sin block inside the packed basis
_LANE_W = 2 * _HALF         # 128: lane-dense width of one spectrogram frame
_DB_PAD = -100.0            # 10*log10(amin) with amin=1e-10: exact pad-lane dB value


# ------------------------------------------------------------------------
# Kernel 1: hann-windowed real DFT (single packed MXU matmul) + power + dB
#           + per-block max (for the top_db floor).  Bb batches per grid step.
# ------------------------------------------------------------------------
def _spect_db_kernel(frames_ref, basis_ref, db_ref, bmax_ref, *, n_freq):
    # frames_ref: (rows_blk, n_dft)  bf16   rows_blk = Bb * n_frames
    # basis_ref : (n_dft, 128)       bf16   [hann*cos | 0 | hann*sin | 0]
    # db_ref    : (rows_blk, 128)    f32    lanes [0, n_freq) real, rest == -100 dB
    # bmax_ref  : (1, 1, 1)          f32    max dB over this block
    y = jnp.dot(frames_ref[...], basis_ref[...],
                preferred_element_type=jnp.float32)                # (rows, 128)
    p = y * y
    # lanes k < 64 hold re_k^2, lanes k >= 64 hold im_{k-64}^2; a half-ring roll
    # (XLU, free slot) adds the two halves so lanes [0, n_freq) carry |X_k|^2.
    power = p + pltpu.roll(p, shift=_HALF, axis=1)
    # AmplitudeToDB(power): multiplier=10, amin=1e-10, ref=1 -> db_multiplier=0.
    db = 10.0 * jnp.log10(jnp.maximum(power, 1e-10))
    lane = jax.lax.broadcasted_iota(jnp.int32, db.shape, 1)
    db = jnp.where(lane < n_freq, db, _DB_PAD)                     # exact pad value
    db_ref[...] = db                                               # lane-dense store
    mx = jnp.max(db, axis=1, keepdims=True)                        # pads never exceed
    bmax_ref[0] = jnp.max(mx, axis=0, keepdims=True)


# ------------------------------------------------------------------------
# Kernel 2 (fused, K-tiled): top_db clamp + InstanceNorm2d(1) + Linear + ReLU
#                            + BatchNorm1d (training-mode batch statistics).
# Uses dot(yn, w) = rsqrt(var+eps) * (dot(y, w) - mean * colsum(w)).
# ------------------------------------------------------------------------
def _norm_fc_bn_kernel(bmax_ref, flat_ref, w_ref, b_ref, gamma_ref, beta_ref,
                       csum_ref, out_ref, acc_ref, s_ref, ss_ref,
                       *, n_valid, n_pad):
    # bmax_ref : (nb, 1, 1) f32   per-block dB maxima from kernel 1 (resident)
    # flat_ref : (B, tk)    f32   K-chunk of the padded dB spectrogram
    # w_ref    : (tk, out)  bf16  K-chunk of the padded FC weight (zero pad rows)
    # csum_ref : (1, out)   f32   column sums of the (bf16-quantized) FC weight
    # scratch  : acc (B,out) f32, s (B,1) f32, ss (B,1) f32
    k = pl.program_id(0)

    @pl.when(k == 0)
    def _():
        acc_ref[...] = jnp.zeros_like(acc_ref)
        s_ref[...] = jnp.zeros_like(s_ref)
        ss_ref[...] = jnp.zeros_like(ss_ref)

    floor = jnp.max(bmax_ref[...], axis=0) - 80.0        # (1,1) global-max top_db floor
    shift = floor + 40.0                                  # center of the clamp range
    y = jnp.maximum(flat_ref[...], floor) - shift         # (B, tk), |y| <= 40 (stability)
    s_ref[...] += jnp.sum(y, axis=1, keepdims=True)
    ss_ref[...] += jnp.sum(y * y, axis=1, keepdims=True)
    acc_ref[...] += jnp.dot(y, w_ref[...].astype(jnp.float32),
                            preferred_element_type=jnp.float32)

    @pl.when(k == pl.num_programs(0) - 1)
    def _():
        # Pad lanes equal exactly max(-100, floor) after the clamp -> closed-form
        # removal from the per-sample (InstanceNorm) statistics; the Linear already
        # ignores them via the zero weight rows.
        v_pad = jnp.maximum(jnp.float32(_DB_PAD), floor) - shift
        s = s_ref[...] - n_pad * v_pad
        ss = ss_ref[...] - n_pad * v_pad * v_pad
        mean = s / n_valid                                         # (B,1) (shifted) mean
        var = jnp.maximum(ss / n_valid - mean * mean, 0.0)
        inv = jax.lax.rsqrt(var + 1e-5)                            # InstanceNorm2d eps
        h = inv * (acc_ref[...] - mean * csum_ref[...]) + b_ref[...]
        h = jnp.maximum(h, 0.0)                                    # ReLU
        mu = jnp.mean(h, axis=0, keepdims=True)                    # BatchNorm1d batch stats
        bvar = jnp.mean((h - mu) ** 2, axis=0, keepdims=True)
        out_ref[...] = (gamma_ref[...] * (h - mu) * jax.lax.rsqrt(bvar + 1e-5)
                        + beta_ref[...])


# ------------------------------------------------------------------------
# Init-time constants (hoisted out of the jitted wrapper).
# ------------------------------------------------------------------------
def build_dft_basis(n_dft):
    """Packed 128-lane windowed real-DFT basis [hann*cos | 0 | hann*sin | 0] (bf16)."""
    n_freq = n_dft // 2 + 1
    assert n_freq <= _HALF, "packed basis requires n_dft//2 + 1 <= 64"
    n = jnp.arange(n_dft, dtype=jnp.float32)
    window = 0.5 * (1.0 - jnp.cos(2.0 * jnp.pi * n / n_dft))       # periodic hann
    k = jnp.arange(n_freq, dtype=jnp.float32)
    ang = 2.0 * jnp.pi * n[:, None] * k[None, :] / n_dft
    basis = jnp.zeros((n_dft, _LANE_W), jnp.float32)
    basis = basis.at[:, :n_freq].set(jnp.cos(ang) * window[:, None])
    basis = basis.at[:, _HALF:_HALF + n_freq].set(jnp.sin(ang) * window[:, None])
    return basis.astype(jnp.bfloat16)


def build_fc_weights(w_pt, n_dft, n_frames):
    """Permute the PyTorch Linear weight (out, freq*time flatten) into the kernels'
    (time, 128-lane padded freq) layout, zero-fill pad rows, quantize to bf16, and
    precompute the column sums used by the fused InstanceNorm/Linear identity."""
    n_freq = n_dft // 2 + 1
    out_features = w_pt.shape[0]
    t = jnp.arange(n_frames)
    f = jnp.arange(n_freq)
    rows = (t[:, None] * _LANE_W + f[None, :]).reshape(-1)          # padded (time, freq)
    cols = (f[None, :] * n_frames + t[:, None]).reshape(-1)         # torch (freq, time)
    w_pad = jnp.zeros((n_frames * _LANE_W, out_features), jnp.float32)
    w_pad = w_pad.at[rows].set(w_pt.T[cols])
    w_pad = w_pad.astype(jnp.bfloat16)
    w_csum = jnp.sum(w_pad.astype(jnp.float32), axis=0, keepdims=True)
    return w_pad, w_csum


def _pick_batch_block(batch, n_frames, target_rows=512):
    """Smallest divisor Bb of `batch` whose Bb*n_frames row count is sublane-aligned and
    gives the MXU a reasonably sized M tile; falls back to the whole batch (full dim)."""
    for bb in range(1, batch + 1):
        if batch % bb == 0 and (bb * n_frames) % 16 == 0 and bb * n_frames >= target_rows:
            return bb
    return batch


def _pick_k_tile(n_frames, max_cols):
    """Largest K chunk (a whole number of 128-lane frames) that divides K and fits max_cols."""
    d = 1
    for cand in range(1, n_frames + 1):
        if n_frames % cand == 0 and cand * _LANE_W <= max_cols:
            d = cand
    return d * _LANE_W


# ------------------------------------------------------------------------
# Wrapper
# ------------------------------------------------------------------------
@functools.partial(jax.jit, static_argnames=("n_dft", "n_hop", "k_cols"))
def mid_spectrogram_layer(x, basis, w_pad, w_csum, b, gamma, beta,
                          *, n_dft, n_hop, k_cols=2048):
    """x: (B, 1, T).  basis / w_pad / w_csum from build_dft_basis / build_fc_weights."""
    B, C, T = x.shape
    assert C == 1
    n_freq = n_dft // 2 + 1
    if n_freq > _HALF:
        # TODO(synk): for n_dft > 126 fall back to a two-half [cos|pad128|sin|pad128]
        # basis (width 2*ceil128(n_freq)) instead of the packed 128-lane basis.
        raise NotImplementedError("packed basis requires n_dft//2 + 1 <= 64")
    n_frames = T // n_hop + 1                                      # center=True framing
    pad = n_dft // 2
    assert (n_frames - 1) * n_hop + n_dft <= T + 2 * pad

    # --- XLA glue: reflect pad (torch.stft center=True), framing, bf16 cast ---
    sig_p = jnp.pad(x[:, 0, :], ((0, 0), (pad, pad)), mode="reflect")
    if n_hop == n_dft:                                             # module default: free reshape
        frames = sig_p[:, : n_frames * n_dft].reshape(B * n_frames, n_dft)
    else:
        # TODO(synk): replace this XLA gather with Pallas-side framing (scalar-prefetched
        # frame starts + strided DMA) if the n_hop != n_dft path is ever exercised.
        starts = jnp.arange(n_frames) * n_hop
        idx = starts[:, None] + jnp.arange(n_dft)[None, :]
        frames = sig_p[:, idx].reshape(B * n_frames, n_dft)
    # Memory-bound path -> bf16 (keep an f32 path here for bit-level parity tests).
    frames = frames.astype(jnp.bfloat16)

    # --- kernel 1: windowed rDFT + |.|^2 + dB, Bb batches per grid step ---
    bb = _pick_batch_block(B, n_frames)
    nb = B // bb
    rows_blk = bb * n_frames
    db, bmax = pl.pallas_call(
        functools.partial(_spect_db_kernel, n_freq=n_freq),
        out_shape=(
            jax.ShapeDtypeStruct((B * n_frames, _LANE_W), jnp.float32),
            jax.ShapeDtypeStruct((nb, 1, 1), jnp.float32),
        ),
        grid=(nb,),
        in_specs=[
            pl.BlockSpec((rows_blk, n_dft), lambda i: (i, 0)),
            pl.BlockSpec((n_dft, _LANE_W), lambda i: (0, 0)),      # constant -> stays resident
        ],
        out_specs=(
            pl.BlockSpec((rows_blk, _LANE_W), lambda i: (i, 0)),
            pl.BlockSpec((1, 1, 1), lambda i: (i, 0, 0)),
        ),
        compiler_params=pltpu.CompilerParams(dimension_semantics=("parallel",)),
    )(frames, basis)

    # (time, padded-freq) flatten: collapsing contiguous trailing dims is free.
    K = n_frames * _LANE_W
    flat = db.reshape(B, K)

    # --- kernel 2: clamp + InstanceNorm2d(1) + Linear + ReLU + BatchNorm1d,
    #     K-tiled with VMEM accumulators (pipelined, bounded VMEM for v7x) ---
    out_features = w_pad.shape[1]
    tk = _pick_k_tile(n_frames, k_cols)
    n_k = K // tk
    n_valid = float(n_frames * n_freq)
    n_pad_cols = float(K - n_frames * n_freq)
    out = pl.pallas_call(
        functools.partial(_norm_fc_bn_kernel, n_valid=n_valid, n_pad=n_pad_cols),
        out_shape=jax.ShapeDtypeStruct((B, out_features), jnp.float32),
        grid=(n_k,),
        in_specs=[
            pl.BlockSpec((nb, 1, 1), lambda k: (0, 0, 0)),          # bmax (resident)
            pl.BlockSpec((B, tk), lambda k: (0, k)),                # dB chunk
            pl.BlockSpec((tk, out_features), lambda k: (k, 0)),     # weight chunk (bf16)
            pl.BlockSpec((1, out_features), lambda k: (0, 0)),      # bias
            pl.BlockSpec((1, out_features), lambda k: (0, 0)),      # BN gamma
            pl.BlockSpec((1, out_features), lambda k: (0, 0)),      # BN beta
            pl.BlockSpec((1, out_features), lambda k: (0, 0)),      # colsum(w)
        ],
        out_specs=pl.BlockSpec((B, out_features), lambda k: (0, 0)),
        scratch_shapes=[
            pltpu.VMEM((B, out_features), jnp.float32),             # dot accumulator
            pltpu.VMEM((B, 1), jnp.float32),                        # sum(y)
            pltpu.VMEM((B, 1), jnp.float32),                        # sum(y^2)
        ],
        compiler_params=pltpu.CompilerParams(dimension_semantics=("arbitrary",)),
    )(bmax, flat, w_pad, b, gamma, beta, w_csum)
    return out


if __name__ == "__main__":
    # Small, module-consistent shapes (module defaults n_dft = n_hop = 64):
    #   T = 448 -> n_frames = T // n_hop + 1 = 8, n_freq = 33,
    #   in_features = 33 * 8 = 264 (same formula as the module, with T in place of 9000),
    #   out_features = 32, batch = 2.
    B, T = 2, 448
    n_dft = n_hop = 64
    out_features = 32
    n_freq = n_dft // 2 + 1
    n_frames = T // n_hop + 1
    in_features = n_freq * n_frames

    key = jax.random.PRNGKey(0)
    kx, kw, kb = jax.random.split(key, 3)

    x = jax.random.normal(kx, (B, 1, T), dtype=jnp.float32)

    # Synthetic PyTorch-layout Linear weight: (out_features, in_features), input dim
    # flattened in (freq, time) order as nn.Flatten produces after unsqueeze(1).
    w_pt = jax.random.normal(kw, (out_features, in_features), dtype=jnp.float32) / jnp.sqrt(
        jnp.float32(in_features)
    )
    b = jax.random.normal(kb, (1, out_features), dtype=jnp.float32) * 0.01
    gamma = jnp.ones((1, out_features), dtype=jnp.float32)          # BatchNorm1d weight
    beta = jnp.zeros((1, out_features), dtype=jnp.float32)          # BatchNorm1d bias

    # Init-time constants (hoisted out of the jitted forward).
    basis = build_dft_basis(n_dft)
    w_pad, w_csum = build_fc_weights(w_pt, n_dft, n_frames)

    # k_cols=512 so the demo also exercises the multi-step K-tiled accumulator path.
    out = mid_spectrogram_layer(x, basis, w_pad, w_csum, b, gamma, beta,
                                n_dft=n_dft, n_hop=n_hop, k_cols=512)
    out = jax.block_until_ready(out)
    assert out.shape == (B, out_features), out.shape
    assert bool(jnp.all(jnp.isfinite(out)))
    print("KERNEL_OK")
</pallas_src>

<mosaic_0001>
module attributes {stable_mosaic.version = 11 : i64} {
  func.func @_spect_db_kernel(%arg0: i32, %arg1: memref<16x64xbf16, #tpu.memory_space<vmem>>, %arg2: memref<64x128xbf16, #tpu.memory_space<vmem>>, %arg3: memref<16x128xf32, #tpu.memory_space<vmem>>, %arg4: memref<1x1x1xf32, #tpu.memory_space<vmem>>) attributes {dimension_semantics = [#tpu.dimension_semantics<parallel>], iteration_bounds = array<i64: 1>, scalar_prefetch = 0 : i64, scratch_operands = 0 : i64, tpu.core_type = #tpu.core_type<tc>, window_params = [{transform_indices = @transform_0, window_bounds = array<i64: 16, 64>}, {pipeline_mode = #tpu.pipeline_mode<synchronous>, transform_indices = @transform_1, window_bounds = array<i64: 64, 128>}, {transform_indices = @transform_2, window_bounds = array<i64: 16, 128>}, {transform_indices = @transform_3, window_bounds = array<i64: 1, 1, 1>}]} {
    %c0 = arith.constant 0 : index
    %c0_0 = arith.constant 0 : index
    %0 = vector.load %arg1[%c0, %c0_0] : memref<16x64xbf16, #tpu.memory_space<vmem>>, vector<16x64xbf16>
    %c0_1 = arith.constant 0 : index
    %c0_2 = arith.constant 0 : index
    %1 = vector.load %arg2[%c0_1, %c0_2] : memref<64x128xbf16, #tpu.memory_space<vmem>>, vector<64x128xbf16>
    %cst = arith.constant dense<0.000000e+00> : vector<16x128xf32>
    %2 = tpu.matmul %0, %1, %cst {dimension_numbers = #tpu.dot_dimension_numbers<[1], [0], [0], [1], [0, 0, 1, 1], [], []>} : vector<16x64xbf16>, vector<64x128xbf16>, vector<16x128xf32> -> vector<16x128xf32>
    %3 = arith.mulf %2, %2 : vector<16x128xf32>
    %c64_i32 = arith.constant 64 : i32
    %4 = tpu.dynamic_rotate %3 by %c64_i32 dim 1 : vector<16x128xf32>, i32 -> vector<16x128xf32>
    %5 = arith.addf %3, %4 : vector<16x128xf32>
    %cst_3 = arith.constant 1.000000e-10 : f32
    %6 = vector.broadcast %cst_3 : f32 to vector<16x128xf32>
    %7 = arith.maximumf %5, %6 : vector<16x128xf32>
    %8 = math.log %7 : vector<16x128xf32>
    %cst_4 = arith.constant 0.434294492 : f32
    %9 = vector.broadcast %cst_4 : f32 to vector<16x128xf32>
    %10 = arith.mulf %8, %9 : vector<16x128xf32>
    %cst_5 = arith.constant 1.000000e+01 : f32
    %11 = vector.broadcast %cst_5 : f32 to vector<16x128xf32>
    %12 = arith.mulf %11, %10 : vector<16x128xf32>
    %13 = tpu.iota {dimensions = array<i32: 1>} : vector<16x128xi32>
    %c33_i32 = arith.constant 33 : i32
    %14 = vector.broadcast %c33_i32 : i32 to vector<16x128xi32>
    %15 = arith.cmpi slt, %13, %14 : vector<16x128xi32>
    %cst_6 = arith.constant -1.000000e+02 : f32
    %16 = vector.broadcast %cst_6 : f32 to vector<16x128xf32>
    %17 = arith.select %15, %12, %16 : vector<16x128xi1>, vector<16x128xf32>
    %c0_7 = arith.constant 0 : index
    %c0_8 = arith.constant 0 : index
    %18 = vector.load %arg3[%c0_7, %c0_8] : memref<16x128xf32, #tpu.memory_space<vmem>>, vector<16x128xf32>
    tpu.vector_store %arg3[%c0_7, %c0_8], %17 {strides = array<i32>} : memref<16x128xf32, #tpu.memory_space<vmem>>, vector<16x128xf32>,
    %cst_9 = arith.constant dense<0xFF800000> : vector<16xf32>
    %19 = vector.multi_reduction <maximumf>, %17, %cst_9 [1] : vector<16x128xf32> to vector<16xf32>
    %20 = vector.shape_cast %19 : vector<16xf32> to vector<16x1xf32>
    %cst_10 = arith.constant dense<0xFF800000> : vector<1xf32>
    %21 = vector.multi_reduction <maximumf>, %20, %cst_10 [0] : vector<16x1xf32> to vector<1xf32>
    %22 = vector.shape_cast %21 : vector<1xf32> to vector<1x1xf32>
    %c0_11 = arith.constant 0 : index
    %c0_12 = arith.constant 0 : index
    %c0_13 = arith.constant 0 : index
    %23 = vector.load %arg4[%c0_11, %c0_12, %c0_13] : memref<1x1x1xf32, #tpu.memory_space<vmem>>, vector<1x1x1xf32>
    %24 = vector.shape_cast %23 : vector<1x1x1xf32> to vector<1x1xf32>
    %25 = vector.shape_cast %22 : vector<1x1xf32> to vector<1x1x1xf32>
    tpu.vector_store %arg4[%c0_11, %c0_12, %c0_13], %25 {strides = array<i32>} : memref<1x1x1xf32, #tpu.memory_space<vmem>>, vector<1x1x1xf32>,
    return
  }
  func.func @transform_0(%arg0: i32) -> (i32, i32) {
    %c0_i32 = arith.constant 0 : i32
    %c0_i32_0 = arith.constant 0 : i32
    return %arg0, %c0_i32 : i32, i32
  }
  func.func @transform_1(%arg0: i32) -> (i32, i32) {
    %c0_i32 = arith.constant 0 : i32
    %c0_i32_0 = arith.constant 0 : i32
    %c0_i32_1 = arith.constant 0 : i32
    return %c0_i32, %c0_i32_0 : i32, i32
  }
  func.func @transform_2(%arg0: i32) -> (i32, i32) {
    %c0_i32 = arith.constant 0 : i32
    %c0_i32_0 = arith.constant 0 : i32
    return %arg0, %c0_i32 : i32, i32
  }
  func.func @transform_3(%arg0: i32) -> (i32, i32, i32) {
    %c0_i32 = arith.constant 0 : i32
    %c0_i32_0 = arith.constant 0 : i32
    %c0_i32_1 = arith.constant 0 : i32
    return %arg0, %c0_i32, %c0_i32_0 : i32, i32, i32
  }
}

module attributes {stable_mosaic.version = 11 : i64} {
  func.func @_norm_fc_bn_kernel(%arg0: i32, %arg1: memref<1x1x1xf32, #tpu.memory_space<vmem>>, %arg2: memref<2x512xf32, #tpu.memory_space<vmem>>, %arg3: memref<512x32xbf16, #tpu.memory_space<vmem>>, %arg4: memref<1x32xf32, #tpu.memory_space<vmem>>, %arg5: memref<1x32xf32, #tpu.memory_space<vmem>>, %arg6: memref<1x32xf32, #tpu.memory_space<vmem>>, %arg7: memref<1x32xf32, #tpu.memory_space<vmem>>, %arg8: memref<2x32xf32, #tpu.memory_space<vmem>>, %arg9: memref<2x32xf32, #tpu.memory_space<vmem>>, %arg10: memref<2x1xf32, #tpu.memory_space<vmem>>, %arg11: memref<2x1xf32, #tpu.memory_space<vmem>>) attributes {dimension_semantics = [#tpu.dimension_semantics<arbitrary>], iteration_bounds = array<i64: 2>, scalar_prefetch = 0 : i64, scratch_operands = 3 : i64, tpu.core_type = #tpu.core_type<tc>, window_params = [{pipeline_mode = #tpu.pipeline_mode<synchronous>, transform_indices = @transform_0, window_bounds = array<i64: 1, 1, 1>}, {transform_indices = @transform_1, window_bounds = array<i64: 2, 512>}, {transform_indices = @transform_2, window_bounds = array<i64: 512, 32>}, {pipeline_mode = #tpu.pipeline_mode<synchronous>, transform_indices = @transform_3, window_bounds = array<i64: 1, 32>}, {pipeline_mode = #tpu.pipeline_mode<synchronous>, transform_indices = @transform_4, window_bounds = array<i64: 1, 32>}, {pipeline_mode = #tpu.pipeline_mode<synchronous>, transform_indices = @transform_5, window_bounds = array<i64: 1, 32>}, {pipeline_mode = #tpu.pipeline_mode<synchronous>, transform_indices = @transform_6, window_bounds = array<i64: 1, 32>}, {pipeline_mode = #tpu.pipeline_mode<synchronous>, transform_indices = @transform_7, window_bounds = array<i64: 2, 32>}]} {
    %c0_i32 = arith.constant 0 : i32
    %0 = arith.cmpi eq, %arg0, %c0_i32 : i32
    %1 = arith.extui %0 : i1 to i32
    %c0_i32_0 = arith.constant 0 : i32
    %2 = arith.cmpi ne, %1, %c0_i32_0 : i32
    scf.if %2 {
      %cst_25 = arith.constant 0.000000e+00 : f32
      %34 = vector.broadcast %cst_25 : f32 to vector<2x32xf32>
      %c0_26 = arith.constant 0 : index
      %c0_27 = arith.constant 0 : index
      %35 = vector.load %arg9[%c0_26, %c0_27] : memref<2x32xf32, #tpu.memory_space<vmem>>, vector<2x32xf32>
      tpu.vector_store %arg9[%c0_26, %c0_27], %34 {strides = array<i32>} : memref<2x32xf32, #tpu.memory_space<vmem>>, vector<2x32xf32>,
      %cst_28 = arith.constant 0.000000e+00 : f32
      %36 = vector.broadcast %cst_28 : f32 to vector<2x1xf32>
      %c0_29 = arith.constant 0 : index
      %c0_30 = arith.constant 0 : index
      %37 = vector.load %arg10[%c0_29, %c0_30] : memref<2x1xf32, #tpu.memory_space<vmem>>, vector<2x1xf32>
      tpu.vector_store %arg10[%c0_29, %c0_30], %36 {strides = array<i32>} : memref<2x1xf32, #tpu.memory_space<vmem>>, vector<2x1xf32>,
      %cst_31 = arith.constant 0.000000e+00 : f32
      %38 = vector.broadcast %cst_31 : f32 to vector<2x1xf32>
      %c0_32 = arith.constant 0 : index
      %c0_33 = arith.constant 0 : index
      %39 = vector.load %arg11[%c0_32, %c0_33] : memref<2x1xf32, #tpu.memory_space<vmem>>, vector<2x1xf32>
      tpu.vector_store %arg11[%c0_32, %c0_33], %38 {strides = array<i32>} : memref<2x1xf32, #tpu.memory_space<vmem>>, vector<2x1xf32>,
    } else {
    }
    %c0 = arith.constant 0 : index
    %c0_1 = arith.constant 0 : index
    %c0_2 = arith.constant 0 : index
    %3 = vector.load %arg1[%c0, %c0_1, %c0_2] : memref<1x1x1xf32, #tpu.memory_space<vmem>>, vector<1x1x1xf32>
    %cst = arith.constant dense<0xFF800000> : vector<1x1xf32>
    %4 = vector.multi_reduction <maximumf>, %3, %cst [0] : vector<1x1x1xf32> to vector<1x1xf32>
    %cst_3 = arith.constant 8.000000e+01 : f32
    %5 = vector.broadcast %cst_3 : f32 to vector<1x1xf32>
    %6 = arith.subf %4, %5 : vector<1x1xf32>
    %cst_4 = arith.constant 4.000000e+01 : f32
    %7 = vector.broadcast %cst_4 : f32 to vector<1x1xf32>
    %8 = arith.addf %6, %7 : vector<1x1xf32>
    %c0_5 = arith.constant 0 : index
    %c0_6 = arith.constant 0 : index
    %9 = vector.load %arg2[%c0_5, %c0_6] : memref<2x512xf32, #tpu.memory_space<vmem>>, vector<2x512xf32>
    %10 = vector.broadcast %6 : vector<1x1xf32> to vector<2x512xf32>
    %11 = arith.maximumf %9, %10 : vector<2x512xf32>
    %12 = vector.broadcast %8 : vector<1x1xf32> to vector<2x512xf32>
    %13 = arith.subf %11, %12 : vector<2x512xf32>
    %c0_7 = arith.constant 0 : index
    %c0_8 = arith.constant 0 : index
    %14 = vector.load %arg10[%c0_7, %c0_8] : memref<2x1xf32, #tpu.memory_space<vmem>>, vector<2x1xf32>
    %cst_9 = arith.constant dense<0.000000e+00> : vector<2xf32>
    %15 = vector.multi_reduction <add>, %13, %cst_9 [1] : vector<2x512xf32> to vector<2xf32>
    %16 = vector.shape_cast %15 : vector<2xf32> to vector<2x1xf32>
    %17 = arith.addf %14, %16 : vector<2x1xf32>
    %c0_10 = arith.constant 0 : index
    %c0_11 = arith.constant 0 : index
    %18 = vector.load %arg10[%c0_10, %c0_11] : memref<2x1xf32, #tpu.memory_space<vmem>>, vector<2x1xf32>
    tpu.vector_store %arg10[%c0_10, %c0_11], %17 {strides = array<i32>} : memref<2x1xf32, #tpu.memory_space<vmem>>, vector<2x1xf32>,
    %c0_12 = arith.constant 0 : index
    %c0_13 = arith.constant 0 : index
    %19 = vector.load %arg11[%c0_12, %c0_13] : memref<2x1xf32, #tpu.memory_space<vmem>>, vector<2x1xf32>
    %20 = arith.mulf %13, %13 : vector<2x512xf32>
    %cst_14 = arith.constant dense<0.000000e+00> : vector<2xf32>
    %21 = vector.multi_reduction <add>, %20, %cst_14 [1] : vector<2x512xf32> to vector<2xf32>
    %22 = vector.shape_cast %21 : vector<2xf32> to vector<2x1xf32>
    %23 = arith.addf %19, %22 : vector<2x1xf32>
    %c0_15 = arith.constant 0 : index
    %c0_16 = arith.constant 0 : index
    %24 = vector.load %arg11[%c0_15, %c0_16] : memref<2x1xf32, #tpu.memory_space<vmem>>, vector<2x1xf32>
    tpu.vector_store %arg11[%c0_15, %c0_16], %23 {strides = array<i32>} : memref<2x1xf32, #tpu.memory_space<vmem>>, vector<2x1xf32>,
    %c0_17 = arith.constant 0 : index
    %c0_18 = arith.constant 0 : index
    %25 = vector.load %arg9[%c0_17, %c0_18] : memref<2x32xf32, #tpu.memory_space<vmem>>, vector<2x32xf32>
    %c0_19 = arith.constant 0 : index
    %c0_20 = arith.constant 0 : index
    %26 = vector.load %arg3[%c0_19, %c0_20] : memref<512x32xbf16, #tpu.memory_space<vmem>>, vector<512x32xbf16>
    %27 = arith.extf %26 : vector<512x32xbf16> to vector<512x32xf32>
    %cst_21 = arith.constant dense<0.000000e+00> : vector<2x32xf32>
    %28 = tpu.matmul %13, %27, %cst_21 {dimension_numbers = #tpu.dot_dimension_numbers<[1], [0], [0], [1], [0, 0, 1, 1], [], []>} : vector<2x512xf32>, vector<512x32xf32>, vector<2x32xf32> -> vector<2x32xf32>
    %29 = arith.addf %25, %28 : vector<2x32xf32>
    %c0_22 = arith.constant 0 : index
    %c0_23 = arith.constant 0 : index
    %30 = vector.load %arg9[%c0_22, %c0_23] : memref<2x32xf32, #tpu.memory_space<vmem>>, vector<2x32xf32>
    tpu.vector_store %arg9[%c0_22, %c0_23], %29 {strides = array<i32>} : memref<2x32xf32, #tpu.memory_space<vmem>>, vector<2x32xf32>,
    %c1_i32 = arith.constant 1 : i32
    %31 = arith.cmpi eq, %arg0, %c1_i32 : i32
    %32 = arith.extui %31 : i1 to i32
    %c0_i32_24 = arith.constant 0 : i32
    %33 = arith.cmpi ne, %32, %c0_i32_24 : i32
    scf.if %33 {
      %cst_25 = arith.constant -1.000000e+02 : f32
      %34 = vector.broadcast %cst_25 : f32 to vector<1x1xf32>
      %35 = arith.maximumf %34, %6 : vector<1x1xf32>
      %36 = arith.subf %35, %8 : vector<1x1xf32>
      %c0_26 = arith.constant 0 : index
      %c0_27 = arith.constant 0 : index
      %37 = vector.load %arg10[%c0_26, %c0_27] : memref<2x1xf32, #tpu.memory_space<vmem>>, vector<2x1xf32>
      %cst_28 = arith.constant 7.600000e+02 : f32
      %38 = vector.broadcast %cst_28 : f32 to vector<1x1xf32>
      %39 = arith.mulf %38, %36 : vector<1x1xf32>
      %40 = vector.broadcast %39 : vector<1x1xf32> to vector<2x1xf32>
      %41 = arith.subf %37, %40 : vector<2x1xf32>
      %c0_29 = arith.constant 0 : index
      %c0_30 = arith.constant 0 : index
      %42 = vector.load %arg11[%c0_29, %c0_30] : memref<2x1xf32, #tpu.memory_space<vmem>>, vector<2x1xf32>
      %cst_31 = arith.constant 7.600000e+02 : f32
      %43 = vector.broadcast %cst_31 : f32 to vector<1x1xf32>
      %44 = arith.mulf %43, %36 : vector<1x1xf32>
      %45 = arith.mulf %44, %36 : vector<1x1xf32>
      %46 = vector.broadcast %45 : vector<1x1xf32> to vector<2x1xf32>
      %47 = arith.subf %42, %46 : vector<2x1xf32>
      %cst_32 = arith.constant 2.640000e+02 : f32
      %48 = vector.broadcast %cst_32 : f32 to vector<2x1xf32>
      %49 = arith.divf %41, %48 : vector<2x1xf32>
      %cst_33 = arith.constant 2.640000e+02 : f32
      %50 = vector.broadcast %cst_33 : f32 to vector<2x1xf32>
      %51 = arith.divf %47, %50 : vector<2x1xf32>
      %52 = arith.mulf %49, %49 : vector<2x1xf32>
      %53 = arith.subf %51, %52 : vector<2x1xf32>
      %cst_34 = arith.constant 0.000000e+00 : f32
      %54 = vector.broadcast %cst_34 : f32 to vector<2x1xf32>
      %55 = arith.maximumf %53, %54 : vector<2x1xf32>
      %cst_35 = arith.constant 9.99999974E-6 : f32
      %56 = vector.broadcast %cst_35 : f32 to vector<2x1xf32>
      %57 = arith.addf %55, %56 : vector<2x1xf32>
      %58 = math.rsqrt %57 : vector<2x1xf32>
      %c0_36 = arith.constant 0 : index
      %c0_37 = arith.constant 0 : index
      %59 = vector.load %arg9[%c0_36, %c0_37] : memref<2x32xf32, #tpu.memory_space<vmem>>, vector<2x32xf32>
      %c0_38 = arith.constant 0 : index
      %c0_39 = arith.constant 0 : index
      %60 = vector.load %arg7[%c0_38, %c0_39] : memref<1x32xf32, #tpu.memory_space<vmem>>, vector<1x32xf32>
      %61 = vector.broadcast %49 : vector<2x1xf32> to vector<2x32xf32>
      %62 = vector.broadcast %60 : vector<1x32xf32> to vector<2x32xf32>
      %63 = arith.mulf %61, %62 : vector<2x32xf32>
      %64 = arith.subf %59, %63 : vector<2x32xf32>
      %65 = vector.broadcast %58 : vector<2x1xf32> to vector<2x32xf32>
      %66 = arith.mulf %65, %64 : vector<2x32xf32>
      %c0_40 = arith.constant 0 : index
      %c0_41 = arith.constant 0 : index
      %67 = vector.load %arg4[%c0_40, %c0_41] : memref<1x32xf32, #tpu.memory_space<vmem>>, vector<1x32xf32>
      %68 = vector.broadcast %67 : vector<1x32xf32> to vector<2x32xf32>
      %69 = arith.addf %66, %68 : vector<2x32xf32>
      %cst_42 = arith.constant 0.000000e+00 : f32
      %70 = vector.broadcast %cst_42 : f32 to vector<2x32xf32>
      %71 = arith.maximumf %69, %70 : vector<2x32xf32>
      %cst_43 = arith.constant dense<0.000000e+00> : vector<32xf32>
      %72 = vector.multi_reduction <add>, %71, %cst_43 [0] : vector<2x32xf32> to vector<32xf32>
      %73 = vector.shape_cast %72 : vector<32xf32> to vector<1x32xf32>
      %cst_44 = arith.constant 2.000000e+00 : f32
      %74 = vector.broadcast %cst_44 : f32 to vector<1x32xf32>
      %75 = arith.divf %73, %74 : vector<1x32xf32>
      %76 = vector.broadcast %75 : vector<1x32xf32> to vector<2x32xf32>
      %77 = arith.subf %71, %76 : vector<2x32xf32>
      %78 = arith.mulf %77, %77 : vector<2x32xf32>
      %cst_45 = arith.constant dense<0.000000e+00> : vector<32xf32>
      %79 = vector.multi_reduction <add>, %78, %cst_45 [0] : vector<2x32xf32> to vector<32xf32>
      %80 = vector.shape_cast %79 : vector<32xf32> to vector<1x32xf32>
      %cst_46 = arith.constant 2.000000e+00 : f32
      %81 = vector.broadcast %cst_46 : f32 to vector<1x32xf32>
      %82 = arith.divf %80, %81 : vector<1x32xf32>
      %c0_47 = arith.constant 0 : index
      %c0_48 = arith.constant 0 : index
      %83 = vector.load %arg5[%c0_47, %c0_48] : memref<1x32xf32, #tpu.memory_space<vmem>>, vector<1x32xf32>
      %84 = vector.broadcast %75 : vector<1x32xf32> to vector<2x32xf32>
      %85 = arith.subf %71, %84 : vector<2x32xf32>
      %86 = vector.broadcast %83 : vector<1x32xf32> to vector<2x32xf32>
      %87 = arith.mulf %86, %85 : vector<2x32xf32>
      %cst_49 = arith.constant 9.99999974E-6 : f32
      %88 = vector.broadcast %cst_49 : f32 to vector<1x32xf32>
      %89 = arith.addf %82, %88 : vector<1x32xf32>
      %90 = math.rsqrt %89 : vector<1x32xf32>
      %91 = vector.broadcast %90 : vector<1x32xf32> to vector<2x32xf32>
      %92 = arith.mulf %87, %91 : vector<2x32xf32>
      %c0_50 = arith.constant 0 : index
      %c0_51 = arith.constant 0 : index
      %93 = vector.load %arg6[%c0_50, %c0_51] : memref<1x32xf32, #tpu.memory_space<vmem>>, vector<1x32xf32>
      %94 = vector.broadcast %93 : vector<1x32xf32> to vector<2x32xf32>
      %95 = arith.addf %92, %94 : vector<2x32xf32>
      %c0_52 = arith.constant 0 : index
      %c0_53 = arith.constant 0 : index
      %96 = vector.load %arg8[%c0_52, %c0_53] : memref<2x32xf32, #tpu.memory_space<vmem>>, vector<2x32xf32>
      tpu.vector_store %arg8[%c0_52, %c0_53], %95 {strides = array<i32>} : memref<2x32xf32, #tpu.memory_space<vmem>>, vector<2x32xf32>,
    } else {
    }
    return
  }
  func.func @transform_0(%arg0: i32) -> (i32, i32, i32) {
    %c0_i32 = arith.constant 0 : i32
    %c0_i32_0 = arith.constant 0 : i32
    %c0_i32_1 = arith.constant 0 : i32
    %c0_i32_2 = arith.constant 0 : i32
    return %c0_i32, %c0_i32_0, %c0_i32_1 : i32, i32, i32
  }
  func.func @transform_1(%arg0: i32) -> (i32, i32) {
    %c0_i32 = arith.constant 0 : i32
    %c0_i32_0 = arith.constant 0 : i32
    return %c0_i32, %arg0 : i32, i32
  }
  func.func @transform_2(%arg0: i32) -> (i32, i32) {
    %c0_i32 = arith.constant 0 : i32
    %c0_i32_0 = arith.constant 0 : i32
    return %arg0, %c0_i32 : i32, i32
  }
  func.func @transform_3(%arg0: i32) -> (i32, i32) {
    %c0_i32 = arith.constant 0 : i32
    %c0_i32_0 = arith.constant 0 : i32
    %c0_i32_1 = arith.constant 0 : i32
    return %c0_i32, %c0_i32_0 : i32, i32
  }
  func.func @transform_4(%arg0: i32) -> (i32, i32) {
    %c0_i32 = arith.constant 0 : i32
    %c0_i32_0 = arith.constant 0 : i32
    %c0_i32_1 = arith.constant 0 : i32
    return %c0_i32, %c0_i32_0 : i32, i32
  }
  func.func @transform_5(%arg0: i32) -> (i32, i32) {
    %c0_i32 = arith.constant 0 : i32
    %c0_i32_0 = arith.constant 0 : i32
    %c0_i32_1 = arith.constant 0 : i32
    return %c0_i32, %c0_i32_0 : i32, i32
  }
  func.func @transform_6(%arg0: i32) -> (i32, i32) {
    %c0_i32 = arith.constant 0 : i32
    %c0_i32_0 = arith.constant 0 : i32
    %c0_i32_1 = arith.constant 0 : i32
    return %c0_i32, %c0_i32_0 : i32, i32
  }
  func.func @transform_7(%arg0: i32) -> (i32, i32) {
    %c0_i32 = arith.constant 0 : i32
    %c0_i32_0 = arith.constant 0 : i32
    %c0_i32_1 = arith.constant 0 : i32
    return %c0_i32, %c0_i32_0 : i32, i32
  }
}

</mosaic_0001>

<bundles_post_ra>
// kernel: mid_spectrogram_layer.2
= control target key start
LH: loop header
LB: loop body
LE: loop exit
PB: predicated region body
PF: predicated region fallthrough
CT: control target
= control target key end

     0   :  { %s234_s0 = inlined_call_operand.vmem [shape: bf16[16,64], index: 0, kind: input, shape index: {}]   ;;  %s235_s1 = inlined_call_operand.vmem [shape: bf16[64,128], index: 1, kind: input, shape index: {}]   ;;  %s236_s2 = inlined_call_operand.vmem [shape: f32[16,128], index: 2, kind: output, shape index: {0}]   ;;  %s237_s3 = inlined_call_operand.hbm [shape: f32[1,1,1], index: 3, kind: output, shape index: {1}]  }
   0x1   :  { %v155_v0 = vld [vmem:[%s235_s1 + $0x18] sm:$0xff] }
   0x2   :  { %9 = vsyncpa [#allocation3], 0  ;;  %62 = vmatpush.bf16.msra.mxu0 %v155_v0  ;;  %v154_v1 = vld [vmem:[%s235_s1 + $0x10] sm:$0xff]  ;;  %v153_v2 = vld [vmem:[%s235_s1 + $0x8] sm:$0xff]  ;;  %vm54_vm0 = vcmask 523264   ;;  %s188_s22 = smov 64   ;;  %v90_v12 = vlaneseq }
   0x3   :  { %v152_v3 = vld [vmem:[%s235_s1] sm:$0xff]  ;;  %s189_s25 = smov [#allocation2]   ;;  %s119_s29 = sshll.u32 %s237_s3, 4  ;;  %vm108_vm2 = vcmask 0   ;;  %s120_s29 = int_to_ptr.hbm [resolvable:$true] %s119_s29 }
   0x4   :  { %v151_v4 = vld [vmem:[%s234_s0] sm:$0xff]  ;;  %v91_v17 = vand.u32 127, %v90_v12  ;;  %s117_s26 = sshll.u32 %s189_s25, 4  ;;  %s118_s26 = int_to_ptr.vmem [resolvable:$true] %s117_s26 }
   0x6   :  { %63 = vmatpush.bf16.msra.mxu0 %v154_v1  ;;  %vm92_vm1 = vcmp.lt.s32.totalorder %v91_v17, 33 }
   0xa   :  { %64 = vmatpush.bf16.msra.mxu0 %v153_v2 }
   0xe   :  { %65 = vmatpush.bf16.msra.mxu0 %v152_v3 }
  0x11   :  { %150 = vmatmul.msk.bf16.vlgmr.msra.gmra.mxu0 %vm54_vm0, %v151_v4 }
  0x8e   :  { %v67_v5 = vpop.f32.mrf.mxu0 }
  0x8f   :  { %v72_v6 = vmul.f32 %v67_v5, %v67_v5 }
  0x91   :  { %74 = vrot.lane.b32.xlu0 %v72_v6, %s188_s22 }
  0x96   :  { %v69_v7 = vpop.f32.mrf.mxu0 }
  0x97   :  { %v73_v8 = vmul.f32 %v69_v7, %v69_v7 }
  0x99   :  { %76 = vrot.lane.b32.xlu0 %v73_v8, %s188_s22 }
 0x103   :  { %v75_v9 = vpop.permute.xlu0 %74 }
 0x104   :  { %v78_v10 = vadd.f32 %v75_v9, %v72_v6 }
 0x106   :  { %v80_v11 = vmax.f32 %v78_v10, 1e-10 }
 0x108   :  { %158 = vlog2.f32 %v80_v11 }
 0x10b   :  { %v77_v13 = vpop.permute.xlu0 %76 }
 0x10c   :  { %v79_v14 = vadd.f32 %v77_v13, %v73_v8 }
 0x10e   :  { %v159_v15 = vpop.eup %158  ;;  %v81_v16 = vmax.f32 %v79_v14, 1e-10 }
 0x10f   :  { %v83_v18 = vmul.f32 0.6931472, %v159_v15 }
 0x110   :  { %160 = vlog2.f32 %v81_v16 }
 0x111   :  { %v86_v19 = vmul.f32 0.4342945, %v83_v18 }
 0x113   :  { %v88_v20 = vmul.f32 10.0, %v86_v19 }
 0x115   :  { %v93_v21 = vsel %vm92_vm1, %v88_v20, -100.0 }
 0x116   :  { %v161_v22 = vpop.eup %160  ;;  %97 = vmax.xlane.f32.xlu1 %v93_v21  ;;  %95 = vst [vmem:[%s236_s2] sm:$0xff] %v93_v21 }
 0x117   :  { %v85_v23 = vmul.f32 0.6931472, %v161_v22 }
 0x119   :  { %v87_v24 = vmul.f32 0.4342945, %v85_v23 }
 0x11b   :  { %v89_v25 = vmul.f32 10.0, %v87_v24 }
 0x11d   :  { %v94_v26 = vsel %vm92_vm1, %v89_v25, -100.0 }
 0x11e   :  { %99 = vmax.xlane.f32.xlu1 %v94_v26  ;;  %96 = vst [vmem:[%s236_s2 + $0x8] sm:$0xff] %v94_v26 }
 0x189   :  { %v98_v27 = vpop.xlane.xlu1 %97 }
 0x191   :  { %v100_v28 = vpop.xlane.xlu1 %99 }
 0x192   :  { %v101_v29 = vmax.f32 %v98_v27, %v100_v28 }
 0x194   :  { %v102_v30 = vrot.slane %v101_v29, 4 }
 0x196   :  { %v103_v31 = vmax.f32 %v101_v29, %v102_v30 }
 0x198   :  { %v104_v32 = vrot.slane %v103_v31, 2 }
 0x19a   :  { %v105_v33 = vmax.f32 %v103_v31, %v104_v32 }
 0x19c   :  { %v106_v34 = vrot.slane %v105_v33, 1 }
 0x19e   :  { %v107_v35 = vmax.f32 %v105_v33, %v106_v34 }
 0x1a0   :  { %109 = vst.msk [vmem:[#allocation2] sm:$0x1] %vm108_vm2, %v107_v35 }
 0x1a1   :  { %122 = dma.vmem_to_hbm [thread:$0]  %s118_s26, 16, %s120_s29, [#allocation3]  }
 0x1a2   :  { %186 = dma.done.wait [#allocation3], 16  }
 0x1a3   :  { %187 = vsyncadd [#allocation3], 4294967280 }
 0x1a4   :  { %129 = vsyncpa [#allocation3], 1 }

// kernel: mid_spectrogram_layer.3
= control target key start
LH: loop header
LB: loop body
LE: loop exit
PB: predicated region body
PF: predicated region fallthrough
CT: control target
= control target key end

     0   :  { %s1153_s0 = inlined_call_operand.<no memory space> [shape: f32[1,1,1], index: 0, kind: input, shape index: {}]   ;;  %s1154_s1 = inlined_call_operand.vmem [shape: f32[2,1024], index: 1, kind: input, shape index: {}]   ;;  %s1155_s2 = inlined_call_operand.vmem [shape: bf16[1024,32], index: 2, kind: input, shape index: {}]   ;;  %s1156_s3 = inlined_call_operand.vmem [shape: f32[1,32], index: 3, kind: input, shape index: {}]   ;;  %s1157_s4 = inlined_call_operand.vmem [shape: f32[1,32], index: 4, kind: input, shape index: {}]   ;;  %s1158_s5 = inlined_call_operand.vmem [shape: f32[1,32], index: 5, kind: input, shape index: {}]   ;;  %s1159_s6 = inlined_call_operand.vmem [shape: f32[1,32], index: 6, kind: input, shape index: {}]   ;;  %s1160_s7 = inlined_call_operand.hbm [shape: f32[2,32], index: 7, kind: output, shape index: {}]  }
   0x1   :  { %v12_v0 = vstv %s1153_s0 }
   0x2   :  { %13 = vst [vmem:[#allocation5] sm:$0x1] %v12_v0 }
   0x3   :  { %14 = vsyncpa [#allocation7], 0  ;;  %s1056_s26 = smov 0  }
   0x4 LB: > { %s1062_s27 = sadd.s32 4294967295, %s1005_s26   ;;  %p762_p0 = scmp.ge.s32.totalorder %s1005_s26, 1  ;;  %s1005_s26 = sphi %s1056_s26, %s20_s26  }
   0x5   : > { %p247_p1 = scmp.lt.s32.totalorder %s1005_s26, 3 }
   0x7   : > { %p248_p2 = pnand %p762_p0, %p247_p1 }
   0x8   : > { %s763_s0 = sshll.u32 (!%p248_p2), %s1062_s27, 2  ;;  %s765_s28 = sshll.u32 (!%p248_p2), %s1062_s27, 6 }
   0x9   : > { %251 = sbr.rel (%p248_p2) target bundleno = 552 (0x228), region = 48  ;;  %p280_p3 = scmp.lt.s32.totalorder (!%p248_p2), %s763_s0, 7 }
   0xa   : > { %p286_p4 = scmp.lt.s32.totalorder (!%p248_p2), %s765_s28, 127  ;;  %p767_p5 = scmp.ne.s32.totalorder (!%p248_p2), %s1062_s27, 0 }
   0xe   : > { %s1162_s0 = smov (!%p280_p3, %s763_s0), 7  ;;  %s1164_s28 = smov (!%p286_p4, %s765_s28), 127 }
   0xf   : > { %s764_s29 = sshll.u32 %s1162_s0, 1  ;;  %s766_s10 = sshll.u32 %s1164_s28, 2 }
  0x10   : > { %s1071_s9 = scalar_lea.vmem %s1154_s1, %s764_s29  ;;  %s1076_s13 = scalar_lea.vmem %s1155_s2, %s766_s10 }
  0x11   : > { %294 = sbr.rel (%p767_p5) target bundleno = 26 (0x1a), region = 52 }
  0x16   : > { %vm295_vm0 = vcmask 254976   ;;  %vm297_vm1 = vcmask 1024   ;;  %v1007_v1 = vmov 0.0  }
  0x17   : > { %296 = vst.msk [vmem:[#allocation2] sm:$0x3] %vm295_vm0, %v1007_v1 }
  0x18   : > { %298 = vst.msk [vmem:[#allocation3] sm:$0x3] %vm297_vm1, %v1007_v1 }
  0x19   : > { %299 = vst.msk [vmem:[#allocation4] sm:$0x3] %vm297_vm1, %v1007_v1 }
  0x1a PF: > { %v300_v2 = vld [vmem:[#allocation5] sm:$0x1]  ;;  %v1008_v3 = vmov 0   ;;  %v908_v8 = vld [vmem:[%s1076_s13 + $0x38] sm:$0xff]   ;;  %v907_v16 = vld [vmem:[%s1076_s13 + $0x30] sm:$0xff]   ;;  %vm329_vm2 = vcmask 1041408  }
  0x1b   : > { %953 = vset.pattern.permute.xlu0 %v1008_v3  ;;  %v1079_v4 = vadd.f32 -80.0, %v300_v2  ;;  %v916_v9 = vld [vmem:[%s1076_s13 + $0x78] sm:$0xff]   ;;  %v805_v11 = vunpack.c.h.bf16 %v908_v8  ;;  %v804_v15 = vunpack.c.l.bf16 %v908_v8  ;;  %v915_v17 = vld [vmem:[%s1076_s13 + $0x70] sm:$0xff]   ;;  %v801_v24 = vunpack.c.h.bf16 %v907_v16  ;;  %v906_v32 = vld [vmem:[%s1076_s13 + $0x28] sm:$0xff]   ;;  %p769_p6 = scmp.ne.s32.totalorder %s1062_s27, 1 }
  0x1c   : > { %v924_v10 = vld [vmem:[%s1076_s13 + $0xb8] sm:$0xff]   ;;  %v837_v12 = vunpack.c.h.bf16 %v916_v9  ;;  %v836_v19 = vunpack.c.l.bf16 %v916_v9  ;;  %v923_v22 = vld [vmem:[%s1076_s13 + $0xb0] sm:$0xff]   ;;  %v833_v25 = vunpack.c.h.bf16 %v915_v17  ;;  %v800_v28 = vunpack.c.l.bf16 %v907_v16  ;;  %v914_v33 = vld [vmem:[%s1076_s13 + $0x68] sm:$0xff]  }
  0x1d   : > { %v305_v5 = vperm.slane %v1079_v4, 0  ;;  %v1083_v6 = vadd.f32 40.0, %v1079_v4  ;;  %v869_v13 = vunpack.c.h.bf16 %v924_v10  ;;  %v932_v14 = vld [vmem:[%s1076_s13 + $0xf8] sm:$0xff]   ;;  %v868_v20 = vunpack.c.l.bf16 %v924_v10  ;;  %v931_v23 = vld [vmem:[%s1076_s13 + $0xf0] sm:$0xff]   ;;  %503 = vmatpush.msra.mxu0 %v805_v11  ;;  %v922_v34 = vld [vmem:[%s1076_s13 + $0xa8] sm:$0xff]  }
  0x1e   : > { %v901_v18 = vunpack.c.h.bf16 %v932_v14  ;;  %v900_v21 = vunpack.c.l.bf16 %v932_v14  ;;  %523 = vmatpush.msra.mxu1 %v837_v12  ;;  %v865_v26 = vunpack.c.h.bf16 %v923_v22  ;;  %v897_v27 = vunpack.c.h.bf16 %v931_v23  ;;  %v930_v38 = vld [vmem:[%s1076_s13 + $0xe8] sm:$0xff]   ;;  %v905_v43 = vld [vmem:[%s1076_s13 + $0x20] sm:$0xff]   ;;  %v904_v52 = vld [vmem:[%s1076_s13 + $0x18] sm:$0xff]  }
  0x1f   : > { %307 = vperm.xlu0 %953, %v305_v5   ;;  %v312_v7 = vperm.slane %v1083_v6, 0  ;;  %543 = vmatpush.msra.mxu2 %v869_v13  ;;  %v832_v29 = vunpack.c.l.bf16 %v915_v17  ;;  %v864_v30 = vunpack.c.l.bf16 %v923_v22  ;;  %v896_v31 = vunpack.c.l.bf16 %v931_v23  ;;  %v913_v44 = vld [vmem:[%s1076_s13 + $0x60] sm:$0xff]   ;;  %v912_v53 = vld [vmem:[%s1076_s13 + $0x58] sm:$0xff]   ;;  %v903_v0 = vld [vmem:[%s1076_s13 + $0x10] sm:$0xff]  }
  0x20   : > { %563 = vmatpush.msra.mxu3 %v901_v18  ;;  %504 = vmatpush.msra.mxu0 %v804_v15  ;;  %v797_v35 = vunpack.c.h.bf16 %v906_v32  ;;  %v829_v36 = vunpack.c.h.bf16 %v914_v33  ;;  %v861_v37 = vunpack.c.h.bf16 %v922_v34  ;;  %v893_v39 = vunpack.c.h.bf16 %v930_v38  ;;  %v921_v45 = vld [vmem:[%s1076_s13 + $0xa0] sm:$0xff]   ;;  %v920_v56 = vld [vmem:[%s1076_s13 + $0x98] sm:$0xff]   ;;  %v911_v1 = vld [vmem:[%s1076_s13 + $0x50] sm:$0xff]  }
  0x21   : > { %524 = vmatpush.msra.mxu1 %v836_v19  ;;  %544 = vmatpush.msra.mxu2 %v868_v20  ;;  %v796_v40 = vunpack.c.l.bf16 %v906_v32  ;;  %v828_v41 = vunpack.c.l.bf16 %v914_v33  ;;  %v860_v42 = vunpack.c.l.bf16 %v922_v34  ;;  %v892_v46 = vunpack.c.l.bf16 %v930_v38  ;;  %v929_v49 = vld [vmem:[%s1076_s13 + $0xe0] sm:$0xff]   ;;  %v928_v57 = vld [vmem:[%s1076_s13 + $0xd8] sm:$0xff]   ;;  %v919_v5 = vld [vmem:[%s1076_s13 + $0x90] sm:$0xff]  }
  0x22   : > { %564 = vmatpush.msra.mxu3 %v900_v21  ;;  %505 = vmatpush.msra.mxu0 %v801_v24  ;;  %v793_v47 = vunpack.c.h.bf16 %v905_v43  ;;  %v825_v48 = vunpack.c.h.bf16 %v913_v44  ;;  %v857_v50 = vunpack.c.h.bf16 %v921_v45  ;;  %v889_v51 = vunpack.c.h.bf16 %v929_v49  ;;  %v902_v18 = vld [vmem:[%s1076_s13 + $0x8] sm:$0xff]   ;;  %v917_v32 = vld [vmem:[%s1076_s13 + $0x80] sm:$0xff]  }
  0x23   : > { %525 = vmatpush.msra.mxu1 %v833_v25  ;;  %545 = vmatpush.msra.mxu2 %v865_v26  ;;  %v792_v54 = vunpack.c.l.bf16 %v905_v43  ;;  %v824_v55 = vunpack.c.l.bf16 %v913_v44  ;;  %v856_v58 = vunpack.c.l.bf16 %v921_v45  ;;  %v888_v59 = vunpack.c.l.bf16 %v929_v49  ;;  %v910_v19 = vld [vmem:[%s1076_s13 + $0x48] sm:$0xff]   ;;  %v775_v26 = vld [vmem:[%s1076_s13] sm:$0xff]  }
  0x24   : > { %565 = vmatpush.msra.mxu3 %v897_v27  ;;  %506 = vmatpush.msra.mxu0 %v800_v28  ;;  %v789_v60 = vunpack.c.h.bf16 %v904_v52  ;;  %v821_v61 = vunpack.c.h.bf16 %v912_v53  ;;  %v853_v62 = vunpack.c.h.bf16 %v920_v56  ;;  %v885_v63 = vunpack.c.h.bf16 %v928_v57  ;;  %v918_v20 = vld [vmem:[%s1076_s13 + $0x88] sm:$0xff]   ;;  %v909_v27 = vld [vmem:[%s1076_s13 + $0x40] sm:$0xff]  }
  0x25   : > { %526 = vmatpush.msra.mxu1 %v832_v29  ;;  %546 = vmatpush.msra.mxu2 %v864_v30  ;;  %v788_v2 = vunpack.c.l.bf16 %v904_v52  ;;  %v820_v3 = vunpack.c.l.bf16 %v912_v53  ;;  %v852_v8 = vunpack.c.l.bf16 %v920_v56  ;;  %v884_v9 = vunpack.c.l.bf16 %v928_v57  ;;  %v926_v24 = vld [vmem:[%s1076_s13 + $0xc8] sm:$0xff]   ;;  %v925_v33 = vld [vmem:[%s1076_s13 + $0xc0] sm:$0xff]  }
  0x26   : > { %566 = vmatpush.msra.mxu3 %v896_v31  ;;  %507 = vmatpush.msra.mxu0 %v797_v35  ;;  %v785_v10 = vunpack.c.h.bf16 %v903_v0  ;;  %v817_v11 = vunpack.c.h.bf16 %v911_v1  ;;  %v849_v12 = vunpack.c.h.bf16 %v919_v5  ;;  %v784_v14 = vunpack.c.l.bf16 %v903_v0  ;;  %v303_v43 = vld [vmem:[%s1071_s9] sm:$0xff] }
  0x27   : > { %314 = vperm.xlu0 %953, %v312_v7   ;;  %527 = vmatpush.msra.mxu1 %v829_v36  ;;  %v927_v7 = vld [vmem:[%s1076_s13 + $0xd0] sm:$0xff]   ;;  %v816_v15 = vunpack.c.l.bf16 %v911_v1  ;;  %v848_v16 = vunpack.c.l.bf16 %v919_v5  ;;  %v781_v21 = vunpack.c.h.bf16 %v902_v18  ;;  %v813_v22 = vunpack.c.h.bf16 %v910_v19 }
  0x28   : > { %547 = vmatpush.msra.mxu2 %v861_v37  ;;  %567 = vmatpush.msra.mxu3 %v893_v39  ;;  %v881_v13 = vunpack.c.h.bf16 %v927_v7  ;;  %v880_v17 = vunpack.c.l.bf16 %v927_v7  ;;  %v845_v23 = vunpack.c.h.bf16 %v918_v20  ;;  %v780_v25 = vunpack.c.l.bf16 %v902_v18 }
  0x29   : > { %508 = vmatpush.msra.mxu0 %v796_v40  ;;  %528 = vmatpush.msra.mxu1 %v828_v41  ;;  %v877_v28 = vunpack.c.h.bf16 %v926_v24  ;;  %v812_v29 = vunpack.c.l.bf16 %v910_v19  ;;  %v844_v30 = vunpack.c.l.bf16 %v918_v20  ;;  %v876_v31 = vunpack.c.l.bf16 %v926_v24 }
  0x2a   : > { %548 = vmatpush.msra.mxu2 %v860_v42  ;;  %568 = vmatpush.msra.mxu3 %v892_v46  ;;  %v777_v34 = vunpack.c.h.bf16 %v775_v26  ;;  %v809_v35 = vunpack.c.h.bf16 %v909_v27  ;;  %v841_v36 = vunpack.c.h.bf16 %v917_v32  ;;  %v873_v37 = vunpack.c.h.bf16 %v925_v33 }
  0x2b   : > { %509 = vmatpush.msra.mxu0 %v793_v47  ;;  %529 = vmatpush.msra.mxu1 %v825_v48  ;;  %v776_v38 = vunpack.c.l.bf16 %v775_v26  ;;  %v808_v39 = vunpack.c.l.bf16 %v909_v27  ;;  %v840_v41 = vunpack.c.l.bf16 %v917_v32  ;;  %v872_v42 = vunpack.c.l.bf16 %v925_v33 }
  0x2c   : > { %549 = vmatpush.msra.mxu2 %v857_v50  ;;  %569 = vmatpush.msra.mxu3 %v889_v51  ;;  %vm340_vm3 = vcmask 1024   ;;  %vm584_vm4 = vcmask 254976  }
  0x2d   : > { %510 = vmatpush.msra.mxu0 %v792_v54  ;;  %530 = vmatpush.msra.mxu1 %v824_v55 }
  0x2e   : > { %550 = vmatpush.msra.mxu2 %v856_v58  ;;  %570 = vmatpush.msra.mxu3 %v888_v59 }
  0x2f   : > { %511 = vmatpush.msra.mxu0 %v789_v60  ;;  %531 = vmatpush.msra.mxu1 %v821_v61 }
  0x30   : > { %551 = vmatpush.msra.mxu2 %v853_v62  ;;  %571 = vmatpush.msra.mxu3 %v885_v63 }
  0x31   : > { %512 = vmatpush.msra.mxu0 %v788_v2  ;;  %532 = vmatpush.msra.mxu1 %v820_v3 }
  0x32   : > { %552 = vmatpush.msra.mxu2 %v852_v8  ;;  %572 = vmatpush.msra.mxu3 %v884_v9 }
  0x33   : > { %513 = vmatpush.msra.mxu0 %v785_v10  ;;  %533 = vmatpush.msra.mxu1 %v817_v11 }
  0x34   : > { %553 = vmatpush.msra.mxu2 %v849_v12  ;;  %573 = vmatpush.msra.mxu3 %v881_v13  ;;  %v318_v12 = vld [vmem:[#allocation3] sm:$0x3] }
  0x35   : > { %514 = vmatpush.msra.mxu0 %v784_v14  ;;  %534 = vmatpush.msra.mxu1 %v816_v15  ;;  %v342_v15 = vld [vmem:[#allocation4] sm:$0x3] }
  0x36   : > { %554 = vmatpush.msra.mxu2 %v848_v16  ;;  %574 = vmatpush.msra.mxu3 %v880_v17 }
  0x37   : > { %515 = vmatpush.msra.mxu0 %v781_v21  ;;  %535 = vmatpush.msra.mxu1 %v813_v22 }
  0x38   : > { %555 = vmatpush.msra.mxu2 %v845_v23  ;;  %575 = vmatpush.msra.mxu3 %v877_v28  ;;  %v365_v23 = vld [vmem:[#allocation2] sm:$0x3] }
  0x39   : > { %516 = vmatpush.msra.mxu0 %v780_v25  ;;  %536 = vmatpush.msra.mxu1 %v812_v29 }
  0x3a   : > { %556 = vmatpush.msra.mxu2 %v844_v30  ;;  %576 = vmatpush.msra.mxu3 %v876_v31 }
  0x3b   : > { %517 = vmatpush.msra.mxu0 %v777_v34  ;;  %537 = vmatpush.msra.mxu1 %v809_v35 }
  0x3c   : > { %557 = vmatpush.msra.mxu2 %v841_v36  ;;  %577 = vmatpush.msra.mxu3 %v873_v37 }
  0x3d   : > { %518 = vmatpush.msra.mxu0 %v776_v38  ;;  %538 = vmatpush.msra.mxu1 %v808_v39 }
  0x3e   : > { %558 = vmatpush.msra.mxu2 %v840_v41  ;;  %578 = vmatpush.msra.mxu3 %v872_v42 }
  0x91   : > { %v308_v40 = vpop.permute.xlu0 %307 }
  0x92   : > { %v310_v44 = vmax.f32 %v303_v43, %v308_v40 }
  0x99   : > { %v315_v45 = vpop.permute.xlu0 %314 }
  0x9a   : > { %v317_v46 = vsub.f32 %v310_v44, %v315_v45 }
  0x9c   : > { %320 = vst [vmem:[#allocation1] ss:$4 sm:$0xff] %v317_v46  ;;  %v343_v47 = vmul.f32 %v317_v46, %v317_v46 }
  0xa3   : > { %v321_v48 = vld.sshfl [vmem:[#allocation1] sm:$0xff pattern:$0x73625140]  ;;  %v322_v49 = vld.sshfl [vmem:[#allocation1 + $0x8] sm:$0xff pattern:$0x73625140] }
  0xa4   : > { %v323_v50 = vld.sshfl [vmem:[#allocation1 + $0x10] sm:$0xff pattern:$0x73625140]  ;;  %v324_v51 = vld.sshfl [vmem:[#allocation1 + $0x18] sm:$0xff pattern:$0x73625140] }
  0xa5   : > { %v330_v52 = vsel %vm329_vm2, %v321_v48, 0.0  ;;  %v331_v53 = vsel %vm329_vm2, %v322_v49, 0.0  ;;  %345 = vst [vmem:[#allocation1] ss:$4 sm:$0xff] %v343_v47  ;;  %v333_v55 = vsel %vm329_vm2, %v323_v50, 0.0  ;;  %v335_v57 = vsel %vm329_vm2, %v324_v51, 0.0 }
  0xa6   : > { %v332_v54 = vadd.f32 %v331_v53, %v330_v52 }
  0xa8   : > { %v334_v56 = vadd.f32 %v333_v55, %v332_v54 }
  0xaa   : > { %v336_v58 = vadd.f32 %v335_v57, %v334_v56 }
  0xac   : > { %337 = vadd.xlane.f32.xlu1 %v336_v58  ;;  %v346_v59 = vld.sshfl [vmem:[#allocation1] sm:$0xff pattern:$0x73625140]  ;;  %v347_v60 = vld.sshfl [vmem:[#allocation1 + $0x8] sm:$0xff pattern:$0x73625140] }
  0xad   : > { %v348_v61 = vld.sshfl [vmem:[#allocation1 + $0x10] sm:$0xff pattern:$0x73625140]  ;;  %v349_v62 = vld.sshfl [vmem:[#allocation1 + $0x18] sm:$0xff pattern:$0x73625140] }
  0xae   : > { %v354_v63 = vsel %vm329_vm2, %v346_v59, 0.0  ;;  %v355_v0 = vsel %vm329_vm2, %v347_v60, 0.0  ;;  %494 = vst [vmem:[#allocation1] ss:$4 sm:$0xff] %v317_v46  ;;  %v357_v2 = vsel %vm329_vm2, %v348_v61, 0.0  ;;  %v359_v5 = vsel %vm329_vm2, %v349_v62, 0.0 }
  0xaf   : > { %v356_v1 = vadd.f32 %v355_v0, %v354_v63 }
  0xb1   : > { %v358_v3 = vadd.f32 %v357_v2, %v356_v1 }
  0xb3   : > { %v360_v7 = vadd.f32 %v359_v5, %v358_v3 }
  0xb5   : > { %361 = vadd.xlane.f32.xlu1 %v360_v7  ;;  %v495_v8 = vld.sshfl [vmem:[#allocation1] sm:$0xff pattern:$0x73625140]  ;;  %v496_v9 = vld.sshfl [vmem:[#allocation1 + $0x8] sm:$0xff pattern:$0x73625140] }
  0xb6   : > { %519 = vmatmul.f32.vlgmr.msra.gmra.mxu0 %v495_v8  ;;  %539 = vmatmul.f32.vlgmr.msra.gmra.mxu1 %v496_v9  ;;  %v497_v10 = vld.sshfl [vmem:[#allocation1 + $0x10] sm:$0xff pattern:$0x73625140]  ;;  %v498_v11 = vld.sshfl [vmem:[#allocation1 + $0x18] sm:$0xff pattern:$0x73625140] }
  0xb7   : > { %559 = vmatmul.f32.vlgmr.msra.gmra.mxu2 %v497_v10  ;;  %579 = vmatmul.f32.vlgmr.msra.gmra.mxu3 %v498_v11 }
 0x11f   : > { %v338_v13 = vpop.xlane.xlu1 %337 }
 0x120   : > { %v339_v14 = vadd.f32 %v338_v13, %v318_v12 }
 0x122   : > { %341 = vst.msk [vmem:[#allocation3] sm:$0x3] %vm340_vm3, %v339_v14 }
 0x128   : > { %v362_v16 = vpop.xlane.xlu1 %361 }
 0x129   : > { %v363_v17 = vadd.f32 %v362_v16, %v342_v15 }
 0x12b   : > { %364 = vst.msk [vmem:[#allocation4] sm:$0x3] %vm340_vm3, %v363_v17 }
 0x133   : > { %v520_v18 = vpop.f32.mrf.mxu0  ;;  %v540_v19 = vpop.f32.mrf.mxu1 }
 0x134   : > { %v541_v20 = vadd.f32 %v540_v19, %v520_v18 }
 0x13a   : > { %v560_v21 = vpop.f32.mrf.mxu2  ;;  %v580_v24 = vpop.f32.mrf.mxu3 }
 0x13b   : > { %v561_v22 = vadd.f32 %v560_v21, %v541_v20 }
 0x13d   : > { %v581_v25 = vadd.f32 %v580_v24, %v561_v22  ;;  %589 = sbr.rel (%p769_p6) target bundleno = 547 (0x223), region = 56 }
 0x13f   : > { %v583_v26 = vadd.f32 %v581_v25, %v365_v23 }
 0x141   : > { %585 = vst.msk [vmem:[#allocation2] sm:$0x3] %vm584_vm4, %v583_v26 }
 0x142   : > { %v590_v27 = vmax.f32 %v1079_v4, -100.0  ;;  %v1009_v28 = vmov 0   ;;  %v1010_v30 = vmov 264.0   ;;  %v592_v37 = vld [vmem:[#allocation3] sm:$0x3]  ;;  %v1011_v58 = vmov 2.0  }
 0x143   : > { %954 = vset.pattern.permute.xlu0 %v1009_v28  ;;  %959 = vrcp.f32 %v1010_v30  ;;  %v598_v38 = vld [vmem:[#allocation4] sm:$0x3]  ;;  %v955_v57 = vld [vmem:[%s1159_s6] ss:$0 sm:$0xff] }
 0x144   : > { %v591_v29 = vsub.f32 %v590_v27, %v1083_v6  ;;  %v956_v63 = vld [vmem:[%s1156_s3] ss:$0 sm:$0xff] }
 0x146   : > { %v593_v31 = vmul.f32 760.0, %v591_v29 }
 0x148   : > { %v599_v32 = vmul.f32 %v593_v31, %v591_v29  ;;  %v595_v35 = vperm.slane %v593_v31, 0  ;;  %v627_v60 = vld [vmem:[#allocation2] sm:$0x3] }
 0x149   : > { %v960_v33 = vpop.eup %959 }
 0x14a   : > { %v605_v34 = vmul.f32 264.0, %v960_v33  ;;  %v601_v36 = vperm.slane %v599_v32, 0  ;;  %v597_v41 = vsub.f32 %v592_v37, %v595_v35  ;;  %vm609_vm5 = vweird.f32 %v960_v33  ;;  %v958_v37 = vld [vmem:[%s1158_s5] ss:$0 sm:$0xff] }
 0x14c   : > { %v606_v39 = vsub.f32 1.0, %v605_v34  ;;  %v603_v42 = vsub.f32 %v598_v38, %v601_v36  ;;  %v957_v34 = vld [vmem:[%s1157_s4] ss:$0 sm:$0xff] }
 0x14e   : > { %v607_v40 = vmul.f32 %v960_v33, %v606_v39 }
 0x150   : > { %v608_v4 = vadd.f32 %v960_v33, %v607_v40 }
 0x152   : > { %v610_v43 = vsel %vm609_vm5, %v960_v33, %v608_v4 }
 0x153   : > { %v611_v44 = vmul.f32 %v610_v43, %v597_v41  ;;  %v612_v45 = vmul.f32 %v610_v43, %v603_v42 }
 0x155   : > { %631 = vperm.xlu0 %954, %v611_v44   ;;  %v613_v6 = vmul.f32 %v611_v44, %v611_v44 }
 0x157   : > { %v614_v46 = vsub.f32 %v612_v45, %v613_v6 }
 0x159   : > { %v615_v47 = vmax.f32 %v614_v46, 0.0 }
 0x15b   : > { %v616_v48 = vadd.f32 1e-05, %v615_v47 }
 0x15d   : > { %961 = vrsqrt.f32 %v616_v48  ;;  %vm623_vm6 = vweird.f32 %v616_v48 }
 0x15e   : > { %963 = vrcp.f32 %v1011_v58 }
 0x163   : > { %v962_v49 = vpop.eup %961 }
 0x164   : > { %v618_v50 = vmul.f32 %v962_v49, %v616_v48  ;;  %vm624_vm7 = vweird.f32 %v962_v49  ;;  %v964_v61 = vpop.eup %963 }
 0x165   : > { %vm625_vm8 = vmor %vm623_vm6, %vm624_vm7  ;;  %v659_v1 = vmul.f32 2.0, %v964_v61  ;;  %vm663_vm9 = vweird.f32 %v964_v61 }
 0x166   : > { %v619_v51 = vmul.f32 %v962_v49, %v618_v50 }
 0x167   : > { %v660_v5 = vsub.f32 1.0, %v659_v1 }
 0x168   : > { %v620_v52 = vmul.f32 0.5, %v619_v51 }
 0x169   : > { %v661_v10 = vmul.f32 %v964_v61, %v660_v5 }
 0x16a   : > { %v621_v53 = vsub.f32 1.5, %v620_v52 }
 0x16b   : > { %v662_v13 = vadd.f32 %v964_v61, %v661_v10 }
 0x16c   : > { %v622_v54 = vmul.f32 %v962_v49, %v621_v53 }
 0x16d   : > { %v664_v16 = vsel %vm663_vm9, %v964_v61, %v662_v13 }
 0x16e   : > { %v626_v55 = vsel %vm625_vm8, %v962_v49, %v622_v54 }
 0x16f   : > { %641 = vperm.xlu0 %954, %v626_v55  }
 0x1c7   : > { %v632_v56 = vpop.permute.xlu0 %631 }
 0x1c8   : > { %v637_v59 = vmul.f32 %v955_v57, %v632_v56 }
 0x1ca   : > { %v638_v62 = vsub.f32 %v627_v60, %v637_v59 }
 0x1e1   : > { %v642_v0 = vpop.permute.xlu0 %641 }
 0x1e2   : > { %v644_v2 = vmul.f32 %v642_v0, %v638_v62 }
 0x1e4   : > { %v649_v3 = vadd.f32 %v956_v63, %v644_v2 }
 0x1e6   : > { %v650_v7 = vmax.f32 %v649_v3, 0.0 }
 0x1e8   : > { %v651_v8 = vsel %vm584_vm4, %v650_v7, 0.0 }
 0x1e9   : > { %v652_v9 = vrot.slane %v651_v8, 4 }
 0x1eb   : > { %v653_v11 = vadd.f32 %v652_v9, %v651_v8 }
 0x1ed   : > { %v654_v12 = vrot.slane %v653_v11, 2 }
 0x1ef   : > { %v655_v14 = vadd.f32 %v654_v12, %v653_v11 }
 0x1f1   : > { %v656_v15 = vrot.slane %v655_v14, 1 }
 0x1f3   : > { %v657_v17 = vadd.f32 %v656_v15, %v655_v14 }
 0x1f5   : > { %v665_v18 = vmul.f32 %v664_v16, %v657_v17 }
 0x1f7   : > { %v666_v19 = vsub.f32 %v650_v7, %v665_v18 }
 0x1f9   : > { %v667_v20 = vmul.f32 %v666_v19, %v666_v19  ;;  %v680_v38 = vmul.f32 %v957_v34, %v666_v19 }
 0x1fb   : > { %v668_v21 = vsel %vm584_vm4, %v667_v20, 0.0 }
 0x1fc   : > { %v669_v22 = vrot.slane %v668_v21, 4 }
 0x1fe   : > { %v670_v23 = vadd.f32 %v669_v22, %v668_v21 }
 0x200   : > { %v671_v24 = vrot.slane %v670_v23, 2 }
 0x202   : > { %v672_v25 = vadd.f32 %v671_v24, %v670_v23 }
 0x204   : > { %v673_v26 = vrot.slane %v672_v25, 1 }
 0x206   : > { %v674_v27 = vadd.f32 %v673_v26, %v672_v25 }
 0x208   : > { %v675_v28 = vmul.f32 %v674_v27, %v664_v16 }
 0x20a   : > { %v681_v29 = vadd.f32 1e-05, %v675_v28 }
 0x20c   : > { %965 = vrsqrt.f32 %v681_v29  ;;  %vm688_vm11 = vweird.f32 %v681_v29 }
 0x212   : > { %v966_v30 = vpop.eup %965 }
 0x213   : > { %v683_v31 = vmul.f32 %v966_v30, %v681_v29  ;;  %vm689_vm10 = vweird.f32 %v966_v30 }
 0x214   : > { %vm690_vm12 = vmor %vm688_vm11, %vm689_vm10 }
 0x215   : > { %v684_v32 = vmul.f32 %v966_v30, %v683_v31 }
 0x217   : > { %v685_v33 = vmul.f32 0.5, %v684_v32 }
 0x219   : > { %v686_v35 = vsub.f32 1.5, %v685_v33 }
 0x21b   : > { %v687_v36 = vmul.f32 %v966_v30, %v686_v35 }
 0x21d   : > { %v691_v39 = vsel %vm690_vm12, %v966_v30, %v687_v36 }
 0x21e   : > { %v692_v40 = vmul.f32 %v691_v39, %v680_v38 }
 0x220   : > { %v697_v41 = vadd.f32 %v958_v37, %v692_v40 }
 0x222   : > { %698 = vst.msk [vmem:[#allocation6] sm:$0x3] %vm584_vm4, %v697_v41 }
 0x223 PF: > { %p937_p7 = scmp.eq.s32.totalorder %s1062_s27, 1  ;;  %s1012_s22 = smov [#allocation6]  }
 0x224   : > { %s705_s23 = sshll.u32 %s1012_s22, 4  ;;  %s707_s0 = sshll.u32 %s1160_s7, 4  ;;  %s706_s23 = int_to_ptr.vmem [resolvable:$true] %s705_s23  ;;  %s708_s0 = int_to_ptr.hbm [resolvable:$true] %s707_s0 }
 0x225   : > { %934 = dma.vmem_to_hbm [thread:$0]  (%p937_p7), %s706_s23, 32, %s708_s0, [#allocation7]  }
 0x226   : > { %1000 = dma.done.wait (%p937_p7), [#allocation7], 32  }
 0x227   : > { %1002 = vsyncadd (%p937_p7), [#allocation7], 4294967264 }
 0x228 PF: > { %s20_s26 = sadd.s32 1, %s1005_s26  }
 0x229   : > { %p17_p8 = scmp.ge.s32.totalorder %s20_s26, 4  }
 0x22b   :  { %19 = sbr.rel (!%p17_p8) target bundleno = 4 (0x4), region = 86 }
 0x230   :  { %721 = vsyncpa [#allocation7], 1 }
 0x231   :  { %723 = vsyncpa [#allocation7 + $0x1], 1 }

</bundles_post_ra>
